<compile_context>
chip_gen: v7x
topology: tpu7x:2x2x1
jax: 0.10.0
libtpu: 0.0.40
codegen_flags: <defaults>
</compile_context>

<pallas_src>
import jax
import jax.numpy as jnp
import numpy as np
from jax.experimental import pallas as pl
from jax.experimental.pallas import tpu as pltpu

NUM_MODALITY = 4      # number_modality (input image channels)
NUM_TARGETS = 2       # number_targets  (x / segmentation channels)
NUM_TIMESTEPS = 1000  # diffusion steps

_HAS_STATEFUL_RNG = hasattr(pltpu, "prng_seed") and hasattr(pltpu, "stateful_normal")


# ---------------------------------------------------------------------------
# Diffusion schedule (linear betas; SpacedDiffusion over all 1000 steps ==
# base GaussianDiffusion).  Computed in float64 with numpy to match the
# improved-diffusion reference, stored as f32 tables for the kernel.
# ---------------------------------------------------------------------------
def make_schedule(num_steps=NUM_TIMESTEPS):
    scale = 1000.0 / num_steps
    beta_start = scale * 0.0001
    beta_end = scale * 0.02
    betas = np.linspace(beta_start, beta_end, num_steps, dtype=np.float64)
    alphas_cumprod = np.cumprod(1.0 - betas)
    sqrt_acp = jnp.asarray(np.sqrt(alphas_cumprod), dtype=jnp.float32)
    sqrt_1m_acp = jnp.asarray(np.sqrt(1.0 - alphas_cumprod), dtype=jnp.float32)
    return sqrt_acp, sqrt_1m_acp


def _choose_tile(M, target=1024):
    """Largest multiple-of-8 divisor of M that is <= target (else full M).

    Full-extent blocks are exempt from the (8,128) rule, so TM == M is always
    a legal fallback.  target=1024 keeps each buffer at <= 512 KiB so the
    double-buffered pipeline fits comfortably in scoped VMEM on v5e and v7x.
    """
    if M <= target:
        return M
    for tm in range(target - target % 8, 7, -8):
        if M % tm == 0:
            return tm
    return M


# ---------------------------------------------------------------------------
# Pallas kernels: fused q_sample
#   x_t[b] = sqrt_acp[t[b]] * x[b] + sqrt(1 - acp[t[b]]) * noise[b]
# Scalar-prefetch args (SMEM): t (int32 [B]), sqrt_acp [T], sqrt_1m_acp [T]
# (+ seed [1] for the RNG-fused variant).
# ---------------------------------------------------------------------------
def _q_sample_kernel_fused(t_ref, sacp_ref, s1macp_ref, seed_ref,
                           x_ref, xt_ref, noise_ref):
    b = pl.program_id(0)
    m = pl.program_id(1)
    t = t_ref[b]
    a = sacp_ref[t]       # scalar gather from SMEM
    s = s1macp_ref[t]
    # Unique seed per (batch, tile) so every block draws independent noise.
    pltpu.prng_seed(seed_ref[0], b, m)
    noise = pltpu.stateful_normal(x_ref.shape, jnp.float32)
    noise_ref[...] = noise.astype(noise_ref.dtype)
    xt_ref[...] = (a * x_ref[...] + s * noise).astype(xt_ref.dtype)


def _q_sample_kernel_ext(t_ref, sacp_ref, s1macp_ref,
                         x_ref, noise_ref, xt_ref):
    b = pl.program_id(0)
    t = t_ref[b]
    a = sacp_ref[t]
    s = s1macp_ref[t]
    xt_ref[...] = a * x_ref[...] + s * noise_ref[...]


def _flatten_lane_dense(x):
    B = x.shape[0]
    n_elem = int(np.prod(x.shape[1:]))
    assert n_elem % 128 == 0, "per-batch element count must be a multiple of 128"
    M = n_elem // 128
    return x.reshape(B, M, 128), M


def q_sample_fused(x, t, seed, sqrt_acp, sqrt_1m_acp, tile_target=1024):
    """RNG fused in-kernel.  Returns (x_t, noise), both shaped like x."""
    B = x.shape[0]
    x_r, M = _flatten_lane_dense(x)
    TM = _choose_tile(M, tile_target)
    n_m = M // TM

    n_total = B * M * 128
    cost = pl.CostEstimate(flops=3 * n_total, transcendentals=0,
                           bytes_accessed=3 * 4 * n_total)

    spec = pl.BlockSpec((1, TM, 128), lambda b, m, t, sa, s1, sd: (b, m, 0))
    xt, noise = pl.pallas_call(
        _q_sample_kernel_fused,
        out_shape=(jax.ShapeDtypeStruct((B, M, 128), x.dtype),
                   jax.ShapeDtypeStruct((B, M, 128), x.dtype)),
        grid_spec=pltpu.PrefetchScalarGridSpec(
            num_scalar_prefetch=4,
            grid=(B, n_m),
            in_specs=[spec],
            out_specs=[spec, spec],
        ),
        compiler_params=pltpu.CompilerParams(
            dimension_semantics=("parallel", "parallel")),
        cost_estimate=cost,
    )(t, sqrt_acp, sqrt_1m_acp, seed, x_r)
    return xt.reshape(x.shape), noise.reshape(x.shape)


def q_sample_external(x, noise, t, sqrt_acp, sqrt_1m_acp, tile_target=1024):
    """Fallback path with externally generated noise.  Returns x_t."""
    B = x.shape[0]
    x_r, M = _flatten_lane_dense(x)
    n_r = noise.reshape(B, M, 128)
    TM = _choose_tile(M, tile_target)
    n_m = M // TM

    n_total = B * M * 128
    cost = pl.CostEstimate(flops=3 * n_total, transcendentals=0,
                           bytes_accessed=4 * 4 * n_total)

    spec = pl.BlockSpec((1, TM, 128), lambda b, m, t, sa, s1: (b, m, 0))
    xt = pl.pallas_call(
        _q_sample_kernel_ext,
        out_shape=jax.ShapeDtypeStruct((B, M, 128), x.dtype),
        grid_spec=pltpu.PrefetchScalarGridSpec(
            num_scalar_prefetch=3,
            grid=(B, n_m),
            in_specs=[spec, spec],
            out_specs=spec,
        ),
        compiler_params=pltpu.CompilerParams(
            dimension_semantics=("parallel", "parallel")),
        cost_estimate=cost,
    )(t, sqrt_acp, sqrt_1m_acp, x_r, n_r)
    return xt.reshape(x.shape)


# ---------------------------------------------------------------------------
# DiffUNet.forward equivalent
# ---------------------------------------------------------------------------
class DiffUNetPallas:
    def __init__(self):
        self.sqrt_acp, self.sqrt_1m_acp = make_schedule(NUM_TIMESTEPS)

    def forward(self, image=None, x=None, pred_type=None, step=None, key=None):
        if pred_type == "q_sample":
            key_noise, key_t = jax.random.split(key)
            # UniformSampler.sample: t ~ Uniform{0..T-1}; weight == 1 (unused)
            t = jax.random.randint(key_t, (x.shape[0],), 0, NUM_TIMESTEPS,
                                   dtype=jnp.int32)
            if _HAS_STATEFUL_RNG:
                seed = jax.random.randint(key_noise, (1,), 0,
                                          jnp.iinfo(jnp.int32).max,
                                          dtype=jnp.int32)
                try:
                    x_t, noise = q_sample_fused(x, t, seed,
                                                self.sqrt_acp, self.sqrt_1m_acp)
                    return x_t, t, noise
                except Exception:
                    pass  # fall back to the external-noise kernel below
            noise = jax.random.normal(key_noise, x.shape, dtype=x.dtype)
            x_t = q_sample_external(x, noise, t,
                                    self.sqrt_acp, self.sqrt_1m_acp)
            return x_t, t, noise
        elif pred_type in ("denoise", "ddim_sample"):
            # TODO(synk): requires MONAI BasicUNetEncoder/BasicUNetDe 3D UNet
            # definitions not included in the provided module source.
            raise NotImplementedError(pred_type)
        else:
            raise ValueError(f"unknown pred_type: {pred_type}")


if __name__ == "__main__":
    key = jax.random.PRNGKey(0)
    key_x, key_fwd = jax.random.split(key)

    # small shapes consistent with the module: x is (B, number_targets, D, H, W)
    B, C, D, H, W = 2, NUM_TARGETS, 16, 16, 16
    x = jax.random.normal(key_x, (B, C, D, H, W), dtype=jnp.float32)

    model = DiffUNetPallas()
    x_t, t, noise = model.forward(x=x, pred_type="q_sample", key=key_fwd)
    jax.block_until_ready((x_t, t, noise))

    # cross-check the fused FMA against plain-JAX using the returned t / noise
    a = model.sqrt_acp[t].reshape(B, 1, 1, 1, 1)
    s = model.sqrt_1m_acp[t].reshape(B, 1, 1, 1, 1)
    ref = a * x + s * noise
    assert jnp.allclose(x_t, ref, atol=1e-5, rtol=1e-5)
    assert bool(jnp.all((t >= 0) & (t < NUM_TIMESTEPS)))
    # loose sanity check on the gaussian noise stream (kernel RNG or jax RNG)
    assert abs(float(jnp.mean(noise))) < 0.15
    assert abs(float(jnp.std(noise)) - 1.0) < 0.15

    print("KERNEL_OK")
</pallas_src>

<mosaic_0001>
module attributes {stable_mosaic.version = 11 : i64} {
  func.func @_q_sample_kernel_fused(%arg0: i32, %arg1: i32, %arg2: memref<2xi32, #tpu.memory_space<smem>>, %arg3: memref<1000xf32, #tpu.memory_space<smem>>, %arg4: memref<1000xf32, #tpu.memory_space<smem>>, %arg5: memref<1xi32, #tpu.memory_space<smem>>, %arg6: memref<1x64x128xf32, #tpu.memory_space<vmem>>, %arg7: memref<1x64x128xf32, #tpu.memory_space<vmem>>, %arg8: memref<1x64x128xf32, #tpu.memory_space<vmem>>) attributes {dimension_semantics = [#tpu.dimension_semantics<parallel>, #tpu.dimension_semantics<parallel>], iteration_bounds = array<i64: 2, 1>, scalar_prefetch = 4 : i64, scratch_operands = 0 : i64, tpu.core_type = #tpu.core_type<tc>, window_params = [{transform_indices = @transform_0, window_bounds = array<i64: 1, 64, 128>}, {transform_indices = @transform_1, window_bounds = array<i64: 1, 64, 128>}, {transform_indices = @transform_2, window_bounds = array<i64: 1, 64, 128>}]} {
    %0 = arith.index_cast %arg0 : i32 to index
    %1 = memref.load %arg2[%0] : memref<2xi32, #tpu.memory_space<smem>>
    %2 = arith.index_cast %1 : i32 to index
    %3 = memref.load %arg3[%2] : memref<1000xf32, #tpu.memory_space<smem>>
    %4 = arith.index_cast %1 : i32 to index
    %5 = memref.load %arg4[%4] : memref<1000xf32, #tpu.memory_space<smem>>
    %c0 = arith.constant 0 : index
    %6 = memref.load %arg5[%c0] : memref<1xi32, #tpu.memory_space<smem>>
    "tpu.prng_set_seed_32"(%6, %arg0, %arg1) : (i32, i32, i32) -> ()
    %c0_i32 = arith.constant 0 : i32
    %c0_i32_0 = arith.constant 0 : i32
    %cst = arith.constant -0.99999994 : f32
    %cst_1 = arith.constant 1.000000e+00 : f32
    %7 = vector.broadcast %cst : f32 to vector<1x1x1xf32>
    %8 = vector.broadcast %cst_1 : f32 to vector<1x1x1xf32>
    %9 = "tpu.prng_random_bits"() : () -> vector<1x64x128xi32>
    %c9_i32 = arith.constant 9 : i32
    %10 = vector.broadcast %c9_i32 : i32 to vector<1x64x128xi32>
    %11 = arith.shrui %9, %10 : vector<1x64x128xi32>
    %c1065353216_i32 = arith.constant 1065353216 : i32
    %12 = vector.broadcast %c1065353216_i32 : i32 to vector<1x64x128xi32>
    %13 = arith.ori %11, %12 : vector<1x64x128xi32>
    %14 = tpu.bitcast %13 : vector<1x64x128xi32> -> vector<1x64x128xf32>
    %cst_2 = arith.constant 1.000000e+00 : f32
    %15 = vector.broadcast %cst_2 : f32 to vector<1x64x128xf32>
    %16 = arith.subf %14, %15 : vector<1x64x128xf32>
    %17 = arith.subf %8, %7 : vector<1x1x1xf32>
    %18 = vector.broadcast %17 : vector<1x1x1xf32> to vector<1x64x128xf32>
    %19 = arith.mulf %16, %18 : vector<1x64x128xf32>
    %20 = vector.broadcast %7 : vector<1x1x1xf32> to vector<1x64x128xf32>
    %21 = arith.addf %19, %20 : vector<1x64x128xf32>
    %22 = vector.broadcast %7 : vector<1x1x1xf32> to vector<1x64x128xf32>
    %23 = arith.maximumf %22, %21 : vector<1x64x128xf32>
    %cst_3 = arith.constant 0.000000e+00 : f32
    %24 = vector.broadcast %cst_3 : f32 to vector<1x64x128xf32>
    %25 = arith.subf %24, %23 : vector<1x64x128xf32>
    %26 = arith.mulf %23, %25 : vector<1x64x128xf32>
    %27 = math.log1p %26 : vector<1x64x128xf32>
    %cst_4 = arith.constant 0.000000e+00 : f32
    %28 = vector.broadcast %cst_4 : f32 to vector<1x64x128xf32>
    %29 = arith.subf %28, %27 : vector<1x64x128xf32>
    %cst_5 = arith.constant 5.000000e+00 : f32
    %30 = vector.broadcast %cst_5 : f32 to vector<1x64x128xf32>
    %31 = arith.cmpf olt, %29, %30 : vector<1x64x128xf32>
    %cst_6 = arith.constant 2.500000e+00 : f32
    %32 = vector.broadcast %cst_6 : f32 to vector<1x64x128xf32>
    %33 = arith.subf %29, %32 : vector<1x64x128xf32>
    %34 = math.sqrt %29 : vector<1x64x128xf32>
    %cst_7 = arith.constant 3.000000e+00 : f32
    %35 = vector.broadcast %cst_7 : f32 to vector<1x64x128xf32>
    %36 = arith.subf %34, %35 : vector<1x64x128xf32>
    %37 = arith.select %31, %33, %36 : vector<1x64x128xi1>, vector<1x64x128xf32>
    %cst_8 = arith.constant 2.81022636E-8 : f32
    %cst_9 = arith.constant -2.00214257E-4 : f32
    %38 = vector.broadcast %cst_8 : f32 to vector<1x64x128xf32>
    %39 = vector.broadcast %cst_9 : f32 to vector<1x64x128xf32>
    %40 = arith.select %31, %38, %39 : vector<1x64x128xi1>, vector<1x64x128xf32>
    %cst_10 = arith.constant 3.43273939E-7 : f32
    %cst_11 = arith.constant 1.00950558E-4 : f32
    %41 = vector.broadcast %cst_10 : f32 to vector<1x64x128xf32>
    %42 = vector.broadcast %cst_11 : f32 to vector<1x64x128xf32>
    %43 = arith.select %31, %41, %42 : vector<1x64x128xi1>, vector<1x64x128xf32>
    %44 = arith.mulf %40, %37 : vector<1x64x128xf32>
    %45 = arith.addf %43, %44 : vector<1x64x128xf32>
    %cst_12 = arith.constant -3.5233877E-6 : f32
    %cst_13 = arith.constant 0.00134934322 : f32
    %46 = vector.broadcast %cst_12 : f32 to vector<1x64x128xf32>
    %47 = vector.broadcast %cst_13 : f32 to vector<1x64x128xf32>
    %48 = arith.select %31, %46, %47 : vector<1x64x128xi1>, vector<1x64x128xf32>
    %49 = arith.mulf %45, %37 : vector<1x64x128xf32>
    %50 = arith.addf %48, %49 : vector<1x64x128xf32>
    %cst_14 = arith.constant -4.39150654E-6 : f32
    %cst_15 = arith.constant -0.00367342844 : f32
    %51 = vector.broadcast %cst_14 : f32 to vector<1x64x128xf32>
    %52 = vector.broadcast %cst_15 : f32 to vector<1x64x128xf32>
    %53 = arith.select %31, %51, %52 : vector<1x64x128xi1>, vector<1x64x128xf32>
    %54 = arith.mulf %50, %37 : vector<1x64x128xf32>
    %55 = arith.addf %53, %54 : vector<1x64x128xf32>
    %cst_16 = arith.constant 2.1858087E-4 : f32
    %cst_17 = arith.constant 0.00573950773 : f32
    %56 = vector.broadcast %cst_16 : f32 to vector<1x64x128xf32>
    %57 = vector.broadcast %cst_17 : f32 to vector<1x64x128xf32>
    %58 = arith.select %31, %56, %57 : vector<1x64x128xi1>, vector<1x64x128xf32>
    %59 = arith.mulf %55, %37 : vector<1x64x128xf32>
    %60 = arith.addf %58, %59 : vector<1x64x128xf32>
    %cst_18 = arith.constant -0.00125372503 : f32
    %cst_19 = arith.constant -0.0076224613 : f32
    %61 = vector.broadcast %cst_18 : f32 to vector<1x64x128xf32>
    %62 = vector.broadcast %cst_19 : f32 to vector<1x64x128xf32>
    %63 = arith.select %31, %61, %62 : vector<1x64x128xi1>, vector<1x64x128xf32>
    %64 = arith.mulf %60, %37 : vector<1x64x128xf32>
    %65 = arith.addf %63, %64 : vector<1x64x128xf32>
    %cst_20 = arith.constant -0.00417768164 : f32
    %cst_21 = arith.constant 0.00943887047 : f32
    %66 = vector.broadcast %cst_20 : f32 to vector<1x64x128xf32>
    %67 = vector.broadcast %cst_21 : f32 to vector<1x64x128xf32>
    %68 = arith.select %31, %66, %67 : vector<1x64x128xi1>, vector<1x64x128xf32>
    %69 = arith.mulf %65, %37 : vector<1x64x128xf32>
    %70 = arith.addf %68, %69 : vector<1x64x128xf32>
    %cst_22 = arith.constant 0.246640727 : f32
    %cst_23 = arith.constant 1.00167406 : f32
    %71 = vector.broadcast %cst_22 : f32 to vector<1x64x128xf32>
    %72 = vector.broadcast %cst_23 : f32 to vector<1x64x128xf32>
    %73 = arith.select %31, %71, %72 : vector<1x64x128xi1>, vector<1x64x128xf32>
    %74 = arith.mulf %70, %37 : vector<1x64x128xf32>
    %75 = arith.addf %73, %74 : vector<1x64x128xf32>
    %cst_24 = arith.constant 1.50140941 : f32
    %cst_25 = arith.constant 2.83297682 : f32
    %76 = vector.broadcast %cst_24 : f32 to vector<1x64x128xf32>
    %77 = vector.broadcast %cst_25 : f32 to vector<1x64x128xf32>
    %78 = arith.select %31, %76, %77 : vector<1x64x128xi1>, vector<1x64x128xf32>
    %79 = arith.mulf %75, %37 : vector<1x64x128xf32>
    %80 = arith.addf %78, %79 : vector<1x64x128xf32>
    %81 = math.absf %23 : vector<1x64x128xf32>
    %cst_26 = arith.constant 1.000000e+00 : f32
    %82 = vector.broadcast %cst_26 : f32 to vector<1x64x128xf32>
    %83 = arith.cmpf oeq, %81, %82 : vector<1x64x128xf32>
    %cst_27 = arith.constant 0x7F800000 : f32
    %84 = vector.broadcast %cst_27 : f32 to vector<1x64x128xf32>
    %85 = arith.mulf %84, %23 : vector<1x64x128xf32>
    %86 = arith.mulf %80, %23 : vector<1x64x128xf32>
    %87 = arith.select %83, %85, %86 : vector<1x64x128xi1>, vector<1x64x128xf32>
    %cst_28 = arith.constant 1.41421354 : f32
    %88 = vector.broadcast %cst_28 : f32 to vector<1x64x128xf32>
    %89 = arith.mulf %88, %87 : vector<1x64x128xf32>
    %c0_29 = arith.constant 0 : index
    %c0_30 = arith.constant 0 : index
    %c0_31 = arith.constant 0 : index
    %90 = vector.load %arg8[%c0_29, %c0_30, %c0_31] : memref<1x64x128xf32, #tpu.memory_space<vmem>>, vector<1x64x128xf32>
    tpu.vector_store %arg8[%c0_29, %c0_30, %c0_31], %89 {strides = array<i32>} : memref<1x64x128xf32, #tpu.memory_space<vmem>>, vector<1x64x128xf32>,
    %c0_32 = arith.constant 0 : index
    %c0_33 = arith.constant 0 : index
    %c0_34 = arith.constant 0 : index
    %91 = vector.load %arg6[%c0_32, %c0_33, %c0_34] : memref<1x64x128xf32, #tpu.memory_space<vmem>>, vector<1x64x128xf32>
    %92 = vector.broadcast %3 : f32 to vector<1x64x128xf32>
    %93 = arith.mulf %92, %91 : vector<1x64x128xf32>
    %94 = vector.broadcast %5 : f32 to vector<1x64x128xf32>
    %95 = arith.mulf %94, %89 : vector<1x64x128xf32>
    %96 = arith.addf %93, %95 : vector<1x64x128xf32>
    %c0_35 = arith.constant 0 : index
    %c0_36 = arith.constant 0 : index
    %c0_37 = arith.constant 0 : index
    %97 = vector.load %arg7[%c0_35, %c0_36, %c0_37] : memref<1x64x128xf32, #tpu.memory_space<vmem>>, vector<1x64x128xf32>
    tpu.vector_store %arg7[%c0_35, %c0_36, %c0_37], %96 {strides = array<i32>} : memref<1x64x128xf32, #tpu.memory_space<vmem>>, vector<1x64x128xf32>,
    return
  }
  func.func @transform_0(%arg0: i32, %arg1: i32, %arg2: memref<2xi32, #tpu.memory_space<smem>>, %arg3: memref<1000xf32, #tpu.memory_space<smem>>, %arg4: memref<1000xf32, #tpu.memory_space<smem>>, %arg5: memref<1xi32, #tpu.memory_space<smem>>) -> (i32, i32, i32) {
    %c0_i32 = arith.constant 0 : i32
    %c0_i32_0 = arith.constant 0 : i32
    return %arg0, %arg1, %c0_i32 : i32, i32, i32
  }
  func.func @transform_1(%arg0: i32, %arg1: i32, %arg2: memref<2xi32, #tpu.memory_space<smem>>, %arg3: memref<1000xf32, #tpu.memory_space<smem>>, %arg4: memref<1000xf32, #tpu.memory_space<smem>>, %arg5: memref<1xi32, #tpu.memory_space<smem>>) -> (i32, i32, i32) {
    %c0_i32 = arith.constant 0 : i32
    %c0_i32_0 = arith.constant 0 : i32
    return %arg0, %arg1, %c0_i32 : i32, i32, i32
  }
  func.func @transform_2(%arg0: i32, %arg1: i32, %arg2: memref<2xi32, #tpu.memory_space<smem>>, %arg3: memref<1000xf32, #tpu.memory_space<smem>>, %arg4: memref<1000xf32, #tpu.memory_space<smem>>, %arg5: memref<1xi32, #tpu.memory_space<smem>>) -> (i32, i32, i32) {
    %c0_i32 = arith.constant 0 : i32
    %c0_i32_0 = arith.constant 0 : i32
    return %arg0, %arg1, %c0_i32 : i32, i32, i32
  }
}

module attributes {stable_mosaic.version = 11 : i64} {
  func.func @_q_sample_kernel_ext(%arg0: i32, %arg1: i32, %arg2: memref<2xi32, #tpu.memory_space<smem>>, %arg3: memref<1000xf32, #tpu.memory_space<smem>>, %arg4: memref<1000xf32, #tpu.memory_space<smem>>, %arg5: memref<1x64x128xf32, #tpu.memory_space<vmem>>, %arg6: memref<1x64x128xf32, #tpu.memory_space<vmem>>, %arg7: memref<1x64x128xf32, #tpu.memory_space<vmem>>) attributes {dimension_semantics = [#tpu.dimension_semantics<parallel>, #tpu.dimension_semantics<parallel>], iteration_bounds = array<i64: 2, 1>, scalar_prefetch = 3 : i64, scratch_operands = 0 : i64, tpu.core_type = #tpu.core_type<tc>, window_params = [{transform_indices = @transform_0, window_bounds = array<i64: 1, 64, 128>}, {transform_indices = @transform_1, window_bounds = array<i64: 1, 64, 128>}, {transform_indices = @transform_2, window_bounds = array<i64: 1, 64, 128>}]} {
    %0 = arith.index_cast %arg0 : i32 to index
    %1 = memref.load %arg2[%0] : memref<2xi32, #tpu.memory_space<smem>>
    %2 = arith.index_cast %1 : i32 to index
    %3 = memref.load %arg3[%2] : memref<1000xf32, #tpu.memory_space<smem>>
    %4 = arith.index_cast %1 : i32 to index
    %5 = memref.load %arg4[%4] : memref<1000xf32, #tpu.memory_space<smem>>
    %c0 = arith.constant 0 : index
    %c0_0 = arith.constant 0 : index
    %c0_1 = arith.constant 0 : index
    %6 = vector.load %arg5[%c0, %c0_0, %c0_1] : memref<1x64x128xf32, #tpu.memory_space<vmem>>, vector<1x64x128xf32>
    %7 = vector.broadcast %3 : f32 to vector<1x64x128xf32>
    %8 = arith.mulf %7, %6 : vector<1x64x128xf32>
    %c0_2 = arith.constant 0 : index
    %c0_3 = arith.constant 0 : index
    %c0_4 = arith.constant 0 : index
    %9 = vector.load %arg6[%c0_2, %c0_3, %c0_4] : memref<1x64x128xf32, #tpu.memory_space<vmem>>, vector<1x64x128xf32>
    %10 = vector.broadcast %5 : f32 to vector<1x64x128xf32>
    %11 = arith.mulf %10, %9 : vector<1x64x128xf32>
    %12 = arith.addf %8, %11 : vector<1x64x128xf32>
    %c0_5 = arith.constant 0 : index
    %c0_6 = arith.constant 0 : index
    %c0_7 = arith.constant 0 : index
    %13 = vector.load %arg7[%c0_5, %c0_6, %c0_7] : memref<1x64x128xf32, #tpu.memory_space<vmem>>, vector<1x64x128xf32>
    tpu.vector_store %arg7[%c0_5, %c0_6, %c0_7], %12 {strides = array<i32>} : memref<1x64x128xf32, #tpu.memory_space<vmem>>, vector<1x64x128xf32>,
    return
  }
  func.func @transform_0(%arg0: i32, %arg1: i32, %arg2: memref<2xi32, #tpu.memory_space<smem>>, %arg3: memref<1000xf32, #tpu.memory_space<smem>>, %arg4: memref<1000xf32, #tpu.memory_space<smem>>) -> (i32, i32, i32) {
    %c0_i32 = arith.constant 0 : i32
    %c0_i32_0 = arith.constant 0 : i32
    return %arg0, %arg1, %c0_i32 : i32, i32, i32
  }
  func.func @transform_1(%arg0: i32, %arg1: i32, %arg2: memref<2xi32, #tpu.memory_space<smem>>, %arg3: memref<1000xf32, #tpu.memory_space<smem>>, %arg4: memref<1000xf32, #tpu.memory_space<smem>>) -> (i32, i32, i32) {
    %c0_i32 = arith.constant 0 : i32
    %c0_i32_0 = arith.constant 0 : i32
    return %arg0, %arg1, %c0_i32 : i32, i32, i32
  }
  func.func @transform_2(%arg0: i32, %arg1: i32, %arg2: memref<2xi32, #tpu.memory_space<smem>>, %arg3: memref<1000xf32, #tpu.memory_space<smem>>, %arg4: memref<1000xf32, #tpu.memory_space<smem>>) -> (i32, i32, i32) {
    %c0_i32 = arith.constant 0 : i32
    %c0_i32_0 = arith.constant 0 : i32
    return %arg0, %arg1, %c0_i32 : i32, i32, i32
  }
}

</mosaic_0001>

<bundles_post_ra>
// kernel: tpu_custom_call.1
= control target key start
LH: loop header
LB: loop body
LE: loop exit
PB: predicated region body
PF: predicated region fallthrough
CT: control target
= control target key end

     0   :  { %s1034_s0 = inlined_call_operand.hbm [shape: s32[2], index: 0, kind: input, shape index: {}]   ;;  %s1035_s3 = inlined_call_operand.hbm [shape: f32[2,64,128], index: 3, kind: input, shape index: {}]   ;;  %s1036_s4 = inlined_call_operand.hbm [shape: f32[2,64,128], index: 4, kind: input, shape index: {}]   ;;  %s1037_s5 = inlined_call_operand.hbm [shape: f32[2,64,128], index: 5, kind: output, shape index: {}]   ;;  %s1038_s1 = inlined_call_operand.hbm [shape: f32[1000], index: 1, kind: input, shape index: {}]   ;;  %s1039_s2 = inlined_call_operand.hbm [shape: f32[1000], index: 2, kind: input, shape index: {}]  }
   0x1   :  { %s516_s20 = scalar_lea.hbm %s1034_s0, 16 }
   0x2   :  { %p517_p0 = scmp.ne.s32.totalorder %s1034_s0, %s516_s20  ;;  %p520_p1 = scmp.lt.u32.totalorder %s516_s20, %s1034_s0 }
   0x4   :  { %p522_p2 = pnand %p520_p1, %p517_p0 }
   0x6   :  { %525 = shalt.err (!%p522_p2)  }
   0x7   :  { %s696_s25 = smov [#allocation3]   ;;  %s526_s30 = scalar_lea.hbm %s1038_s1, 128 }
   0x8   :  { %11 = dma.hbm_to_smem %s1034_s0, 16, %s696_s25, [#allocation2] }
   0x9   :  { %p527_p3 = scmp.ne.s32.totalorder %s1038_s1, %s526_s30  ;;  %p530_p4 = scmp.lt.u32.totalorder %s526_s30, %s1038_s1 }
   0xb   :  { %p532_p5 = pnand %p530_p4, %p527_p3 }
   0xd   :  { %535 = shalt.err (!%p532_p5)  }
   0xe   :  { %s697_s10 = smov [#allocation4]   ;;  %s536_s14 = scalar_lea.hbm %s1039_s2, 128 }
   0xf   :  { %13 = dma.hbm_to_smem %s1038_s1, 128, %s697_s10, [#allocation2] }
  0x10   :  { %p537_p6 = scmp.ne.s32.totalorder %s1039_s2, %s536_s14  ;;  %p540_p7 = scmp.lt.u32.totalorder %s536_s14, %s1039_s2 }
  0x12   :  { %p542_p8 = pnand %p540_p7, %p537_p6 }
  0x14   :  { %545 = shalt.err (!%p542_p8)  }
  0x15   :  { %s698_s19 = smov [#allocation5]  }
  0x16   :  { %15 = dma.hbm_to_smem %s1039_s2, 128, %s698_s19, [#allocation2] }
  0x17   :  { %658 = dma.done.wait [#allocation2], 272 }
  0x18   :  { %659 = vsyncadd [#allocation2], 4294967024 }
  0x19   :  { %17 = sfence }
  0x1a   :  { %18 = vsyncpa [#allocation7], 0 }
  0x1b   :  { %20 = vsyncpa [#allocation7 + $0x1], 0 }
  0x1c   :  { %21 = vsyncpa [#allocation10], 0 }
  0x1d   :  { %23 = vsyncpa [#allocation10 + $0x1], 0 }
  0x1e   :  { %24 = vsyncpa [#allocation8], 0 }
  0x1f   :  { %26 = vsyncpa [#allocation8 + $0x1], 0  ;;  %s772_s1 = smov 0   ;;  %s774_s22 = smov 0  }
  0x20   :  { %s776_s23 = smov 0   ;;  %s778_s24 = smov 0  }
  0x21   :  { %s780_s25 = smov 0   ;;  %s782_s2 = smov 0  }
  0x22 LB: > { %s420_s26 = sadd.s32 4294967295, %s694_s2   ;;  %s421_s27 = sadd.s32 4294967294, %s694_s2   ;;  %s694_s2 = sphi %s782_s2, %s32_s2   ;;  %s690_s25 = sphi %s780_s25, %s1057_s25   ;;  %s686_s24 = sphi %s778_s24, %s1056_s24   ;;  %s682_s23 = sphi %s776_s23, %s1055_s23   ;;  %s678_s22 = sphi %s774_s22, %s1054_s22   ;;  %s674_s1 = sphi %s772_s1, %s1053_s1  }
  0x23   : > { %s44_s28 = sadd.s32 1, %s690_s25  ;;  %s53_s29 = sadd.s32 1, %s682_s23 }
  0x24   : > { %p46_p9 = scmp.ge.s32.totalorder %s44_s28, 2  ;;  %p60_p10 = scmp.ne.s32.totalorder %s682_s23, %s678_s22 }
  0x25   : > { %p61_p11 = scmp.eq.s32.totalorder %s694_s2, 0  ;;  %p66_p12 = scmp.ne.s32.totalorder %s678_s22, %s674_s1 }
  0x26   : > { %s1059_s28 = smov (%p46_p9, %s44_s28), 0  ;;  %p67_p0 = scmp.eq.s32.totalorder %s420_s26, 0 }
  0x27   : > { %p813_p13 = por %p61_p11, %p60_p10  ;;  %s48_s6 = ssub.s32 %s690_s25, %s1059_s28 }
  0x28   : > { %p120_p1 = scmp.eq.s32.totalorder %s420_s26, 1  ;;  %p51_p2 = scmp.eq.s32.totalorder %s48_s6, 0 }
  0x29   : > { %p819_p3 = por %p67_p0, %p66_p12  ;;  %p126_p5 = scmp.eq.s32.totalorder %s421_s27, 1 }
  0x2a   : > { %p823_p4 = por %p120_p1, %p60_p10  ;;  %p459_p8 = scmp.lt.s32.totalorder %s694_s2, 2 }
  0x2b   : > { %s1043_s7 = scalar_select %p819_p3, 1, 0 }
  0x2c   : > { %s1044_s8 = scalar_select %p823_p4, 1, 0 }
  0x2d   : > { %s828_s9 = scalar_select %p51_p2, %s682_s23, %s53_s29  }
  0x2e   : > { %p830_p6 = por %p126_p5, %p66_p12  ;;  %s837_s11 = sand.u32 1, %s682_s23  }
  0x2f   : > { %s424_s12 = sshll.u32 %s837_s11, 6  ;;  %s439_s0 = sshll.u32 %s690_s25, 10 }
  0x30   : > { %s1045_s10 = scalar_select %p830_p6, 1, 0 }
  0x31   : > { %s846_s15 = scalar_lea.hbm %s1035_s3, %s439_s0  ;;  %s150_s16 = scalar_lea.vmem [#allocation6], %s424_s12 }
  0x32   : > { %s159_s17 = sshll.u32 %s150_s16, 4  ;;  %p854_p9 = pnand %p459_p8, %p813_p13  ;;  %s850_s17 = int_to_ptr.vmem [resolvable:$true] %s159_s17 }
  0x33   : > { %s147_s19 = scalar_lea.sflag [#allocation7], %s837_s11  ;;  %s546_s20 = scalar_lea.hbm %s846_s15, 1024 }
  0x34   : > { %p547_p11 = scmp.ne.s32.totalorder %s846_s15, %s546_s20  ;;  %p548_p12 = pneg %p854_p9 }
  0x35   : > { %s551_s27 = scalar_lea.hbm %s1035_s3, 2048  ;;  %p552_p13 = scmp.lt.u32.totalorder %s846_s15, %s1035_s3 }
  0x36   : > { %p549_p0 = pnand %p548_p12, %p547_p11  ;;  %p553_p2 = scmp.lt.u32.totalorder %s551_s27, %s546_s20 }
  0x37   : > { %p555_p8 = scmp.lt.u32.totalorder %s546_s20, %s846_s15 }
  0x38   : > { %p550_p1 = pneg %p549_p0  ;;  %p554_p5 = por %p553_p2, %p552_p13 }
  0x3a   : > { %p556_p7 = por %p555_p8, %p554_p5 }
  0x3c   : > { %p557_p10 = pnand %p556_p7, %p550_p1 }
  0x3e   : > { %560 = shalt.err (!%p557_p10)
}
  0x3f   : > { %s561_s6 = scalar_lea.vmem %s850_s17, 1024  ;;  %s699_s13 = smov [#allocation6]  }
  0x40   : > { %p562_p11 = scmp.ne.s32.totalorder %s850_s17, %s561_s6  ;;  %s566_s14 = sshll.u32 %s699_s13, 4  ;;  %s567_s14 = int_to_ptr.vmem [resolvable:$false] %s566_s14 }
  0x41   : > { %s568_s16 = scalar_lea.vmem %s567_s14, 2048  ;;  %p569_p4 = scmp.lt.s32.totalorder %s850_s17, %s567_s14 }
  0x42   : > { %p564_p0 = pnand %p562_p11, %p548_p12  ;;  %p570_p13 = scmp.lt.s32.totalorder %s568_s16, %s561_s6 }
  0x44   : > { %p565_p6 = pneg %p564_p0  ;;  %p571_p2 = por %p570_p13, %p569_p4 }
  0x46   : > { %p572_p5 = pnand %p571_p2, %p565_p6 }
  0x48   : > { %575 = shalt.err (!%p572_p5)
}
  0x49   : > { %s700_s20 = smov 128   ;;  %s701_s21 = smov 8  }
  0x4a   : > { %451 = dma.hbm_to_vmem [thread:$0]  (!%p854_p9), %s846_s15, 1024, %s850_s17, %s147_s19, %s700_s20, %s700_s20, %s701_s21  }
  0x4b   : > { %p190_p4 = scmp.lt.s32.totalorder %s694_s2, 3  ;;  %s896_s29 = scalar_lea.hbm %s1036_s4, %s439_s0 }
  0x4c   : > { %p1047_p6 = scmp.ge.s32.totalorder %s694_s2, 1  ;;  %s173_s6 = scalar_lea.vmem [#allocation9], %s424_s12 }
  0x4d   : > { %s182_s13 = sshll.u32 %s173_s6, 4  ;;  %s170_s15 = scalar_lea.sflag [#allocation10], %s837_s11  ;;  %s906_s13 = int_to_ptr.vmem [resolvable:$true] %s182_s13 }
  0x4e   : > { %p900_p7 = pnand %p1047_p6, %p190_p4  ;;  %s576_s17 = scalar_lea.hbm %s896_s29, 1024 }
  0x4f   : > { %p577_p10 = scmp.ne.s32.totalorder %s896_s29, %s576_s17  ;;  %s581_s14 = scalar_lea.hbm %s1036_s4, 2048 }
  0x50   : > { %p582_p11 = scmp.lt.u32.totalorder %s896_s29, %s1036_s4  ;;  %p583_p0 = scmp.lt.u32.totalorder %s581_s14, %s576_s17 }
  0x51   : > { %p579_p1 = pnand %p577_p10, %p548_p12  ;;  %p585_p2 = scmp.lt.u32.totalorder %s576_s17, %s896_s29 }
  0x52   : > { %p584_p13 = por %p583_p0, %p582_p11 }
  0x53   : > { %p580_p8 = pneg %p579_p1 }
  0x54   : > { %p586_p5 = por %p585_p2, %p584_p13 }
  0x56   : > { %p587_p4 = pnand %p586_p5, %p580_p8 }
  0x58   : > { %590 = shalt.err (!%p587_p4)
}
  0x59   : > { %s591_s12 = scalar_lea.vmem %s906_s13, 1024  ;;  %s702_s27 = smov [#allocation9]  }
  0x5a   : > { %p592_p6 = scmp.ne.s32.totalorder %s906_s13, %s591_s12  ;;  %s596_s6 = sshll.u32 %s702_s27, 4  ;;  %s597_s6 = int_to_ptr.vmem [resolvable:$false] %s596_s6 }
  0x5b   : > { %s598_s0 = scalar_lea.vmem %s597_s6, 2048  ;;  %p599_p3 = scmp.lt.s32.totalorder %s906_s13, %s597_s6 }
  0x5c   : > { %p594_p10 = pnand %p592_p6, %p548_p12  ;;  %p600_p11 = scmp.lt.s32.totalorder %s598_s0, %s591_s12 }
  0x5e   : > { %p595_p1 = pneg %p594_p10  ;;  %p601_p0 = por %p600_p11, %p599_p3 }
  0x60   : > { %p602_p13 = pnand %p601_p0, %p595_p1 }
  0x62   : > { %605 = shalt.err (!%p602_p13)
}
  0x63   : > { %454 = dma.hbm_to_vmem [thread:$0]  (!%p854_p9), %s896_s29, 1024, %s906_s13, %s170_s15, %s700_s20, %s700_s20, %s701_s21  }
  0x64   : > { %194 = sbr.rel (%p900_p7) target bundleno = 147 (0x93), region = 28  ;;  %s940_s17 = sand.u32 (!%p900_p7), 1, %s678_s22  }
  0x65   : > { %s943_s19 = sshll.u32 (!%p900_p7), %s940_s17, 6  ;;  %s197_s18 = scalar_lea.sflag (!%p900_p7), [#allocation7], %s940_s17 }
  0x66   : > { %s947_s14 = scalar_lea.vmem (!%p900_p7), [#allocation6], %s943_s19  ;;  %p1049_p3 = scmp.ne.s32.totalorder (!%p900_p7), %s1043_s7, 0 }
  0x6b   : > { %661 = dma.done.wait (%p1049_p3), %s197_s18, 1024  }
  0x6c   : > { %663 = vsyncadd (%p1049_p3), %s197_s18, 4294966272  ;;  %s206_s11 = scalar_lea.sflag [#allocation10], %s940_s17  ;;  %s955_s20 = scalar_lea.vmem [#allocation9], %s943_s19 }
  0x6d   : > { %665 = dma.done.wait (%p1049_p3), %s206_s11, 1024  }
  0x6e   : > { %667 = vsyncadd (%p1049_p3), %s206_s11, 4294966272  ;;  %s238_s21 = sld [smem:[#allocation3 + %s686_s24]]  ;;  %v241_v0 = vld [vmem:[%s947_s14] sm:$0xff]  ;;  %v242_v2 = vld [vmem:[%s947_s14 + $0x8] sm:$0xff]  ;;  %s234_s7 = scalar_lea.vmem [#allocation11], %s943_s19 }
  0x6f   : > { %v258_v1 = vld [vmem:[%s955_s20] sm:$0xff]  ;;  %v259_v3 = vld [vmem:[%s955_s20 + $0x8] sm:$0xff]  ;;  %v243_v4 = vld [vmem:[%s947_s14 + $0x10] sm:$0xff]  ;;  %s307_s13 = sshll.u32 %s234_s7, 4  ;;  %s441_s15 = sshll.u32 %s686_s24, 10  ;;  %s980_s13 = int_to_ptr.vmem [resolvable:$true] %s307_s13 }
  0x70   : > { %v260_v5 = vld [vmem:[%s955_s20 + $0x10] sm:$0xff]  ;;  %v244_v6 = vld [vmem:[%s947_s14 + $0x18] sm:$0xff]  ;;  %v245_v10 = vld [vmem:[%s947_s14 + $0x20] sm:$0xff]  ;;  %s985_s26 = scalar_lea.hbm %s1037_s5, %s441_s15  ;;  %s292_s12 = scalar_lea.sflag [#allocation8], %s940_s17 }
  0x71   : > { %v261_v7 = vld [vmem:[%s955_s20 + $0x18] sm:$0xff]  ;;  %v262_v11 = vld [vmem:[%s955_s20 + $0x20] sm:$0xff]  ;;  %v246_v16 = vld [vmem:[%s947_s14 + $0x28] sm:$0xff]  ;;  %s606_s27 = scalar_lea.vmem %s980_s13, 1024  ;;  %p1050_p12 = scmp.ne.s32.totalorder %s1044_s8, 0 }
  0x72   : > { %v263_v17 = vld [vmem:[%s955_s20 + $0x28] sm:$0xff]  ;;  %v247_v22 = vld [vmem:[%s947_s14 + $0x30] sm:$0xff]  ;;  %v248_v24 = vld [vmem:[%s947_s14 + $0x38] sm:$0xff]  ;;  %p607_p9 = scmp.ne.s32.totalorder %s980_s13, %s606_s27  ;;  %s703_s6 = smov [#allocation11]  }
  0x73   : > { %v264_v23 = vld [vmem:[%s955_s20 + $0x30] sm:$0xff]  ;;  %v265_v29 = vld [vmem:[%s955_s20 + $0x38] sm:$0xff]  ;;  %s610_s0 = sshll.u32 %s703_s6, 4  ;;  %s611_s0 = int_to_ptr.vmem [resolvable:$false] %s610_s0 }
  0x74   : > { %s239_s29 = sld [smem:[#allocation4 + %s238_s21]]  ;;  %p608_p7 = pnand %p607_p9, %p1050_p12 }
  0x75   : > { %s240_s30 = sld [smem:[#allocation5 + %s238_s21]]  ;;  %s612_s19 = scalar_lea.vmem %s611_s0, 2048 }
  0x76   : > { %p609_p8 = pneg %p608_p7  ;;  %p613_p2 = scmp.lt.s32.totalorder %s980_s13, %s611_s0 }
  0x77   : > { %p614_p5 = scmp.lt.s32.totalorder %s612_s19, %s606_s27 }
  0x79   : > { %p615_p4 = por %p614_p5, %p613_p2 }
  0x7a   : > { %v249_v8 = vstv %s239_s29 }
  0x7b   : > { %v266_v9 = vstv %s240_s30  ;;  %v250_v12 = vmul.f32 %v249_v8, %v241_v0  ;;  %v251_v14 = vmul.f32 %v249_v8, %v242_v2  ;;  %v252_v18 = vmul.f32 %v249_v8, %v243_v4  ;;  %p616_p6 = pnand %p615_p4, %p609_p8 }
  0x7c   : > { %v267_v13 = vmul.f32 %v266_v9, %v258_v1  ;;  %v268_v15 = vmul.f32 %v266_v9, %v259_v3  ;;  %v269_v19 = vmul.f32 %v266_v9, %v260_v5  ;;  %v253_v20 = vmul.f32 %v249_v8, %v244_v6 }
  0x7d   : > { %v270_v21 = vmul.f32 %v266_v9, %v261_v7  ;;  %v254_v27 = vmul.f32 %v249_v8, %v245_v10  ;;  %v271_v28 = vmul.f32 %v266_v9, %v262_v11  ;;  %v255_v32 = vmul.f32 %v249_v8, %v246_v16 }
  0x7e   : > { %v275_v25 = vadd.f32 %v267_v13, %v250_v12  ;;  %v276_v26 = vadd.f32 %v268_v15, %v251_v14  ;;  %v277_v30 = vadd.f32 %v269_v19, %v252_v18  ;;  %v272_v33 = vmul.f32 %v266_v9, %v263_v17 }
  0x7f   : > { %v278_v31 = vadd.f32 %v270_v21, %v253_v20  ;;  %v279_v34 = vadd.f32 %v271_v28, %v254_v27  ;;  %v256_v35 = vmul.f32 %v249_v8, %v247_v22  ;;  %v273_v36 = vmul.f32 %v266_v9, %v264_v23 }
  0x80   : > { %283 = vst [vmem:[%s234_s7] sm:$0xff] %v275_v25  ;;  %284 = vst [vmem:[%s234_s7 + $0x8] sm:$0xff] %v276_v26  ;;  %v257_v37 = vmul.f32 %v249_v8, %v248_v24  ;;  %v280_v38 = vadd.f32 %v272_v33, %v255_v32  ;;  %v274_v39 = vmul.f32 %v266_v9, %v265_v29 }
  0x81   : > { %285 = vst [vmem:[%s234_s7 + $0x10] sm:$0xff] %v277_v30  ;;  %286 = vst [vmem:[%s234_s7 + $0x18] sm:$0xff] %v278_v31  ;;  %v281_v40 = vadd.f32 %v273_v36, %v256_v35 }
  0x82   : > { %287 = vst [vmem:[%s234_s7 + $0x20] sm:$0xff] %v279_v34  ;;  %288 = vst [vmem:[%s234_s7 + $0x28] sm:$0xff] %v280_v38  ;;  %v282_v41 = vadd.f32 %v274_v39, %v257_v37 }
  0x83   : > { %289 = vst [vmem:[%s234_s7 + $0x30] sm:$0xff] %v281_v40 }
  0x84   : > { %290 = vst [vmem:[%s234_s7 + $0x38] sm:$0xff] %v282_v41 }
  0x85   : > { %619 = shalt.err (!%p616_p6)
}
  0x86   : > { %s620_s18 = scalar_lea.hbm %s985_s26, 1024  ;;  %s624_s20 = scalar_lea.hbm %s1037_s5, 2048 }
  0x87   : > { %p621_p10 = scmp.ne.s32.totalorder %s985_s26, %s620_s18  ;;  %p625_p0 = scmp.lt.u32.totalorder %s985_s26, %s1037_s5 }
  0x88   : > { %p626_p13 = scmp.lt.u32.totalorder %s624_s20, %s620_s18  ;;  %p628_p9 = scmp.lt.u32.totalorder %s620_s18, %s985_s26 }
  0x89   : > { %p622_p1 = pnand %p621_p10, %p1050_p12 }
  0x8a   : > { %p627_p3 = por %p626_p13, %p625_p0 }
  0x8b   : > { %p623_p11 = pneg %p622_p1 }
  0x8c   : > { %p629_p7 = por %p628_p9, %p627_p3 }
  0x8e   : > { %p630_p8 = pnand %p629_p7, %p623_p11 }
  0x90   : > { %633 = shalt.err (!%p630_p8)
}
  0x91   : > { %s704_s30 = smov 128   ;;  %s705_s7 = smov 8  }
  0x92   : > { %446 = dma.vmem_to_hbm [thread:$0]  (%p1050_p12), %s980_s13, 1024, %s985_s26, %s292_s12, %s704_s30, %s704_s30, %s705_s7  }
  0x93 PF: > { %s322_s15 = sand.u32 1, %s674_s1   ;;  %p1051_p2 = scmp.ne.s32.totalorder %s1045_s10, 0 }
  0x94   : > { %p1052_p5 = scmp.ge.s32.totalorder %s694_s2, 2  ;;  %s323_s24 = scalar_lea.sflag [#allocation8], %s322_s15 }
  0x96   : > { %p456_p4 = pnand %p1052_p5, %p1051_p2 }
  0x98   : > { %669 = dma.done.wait (!%p456_p4), %s323_s24, 1024  }
  0x99   : > { %671 = vsyncadd (!%p456_p4), %s323_s24, 4294966272  ;;  %s32_s2 = sadd.s32 1, %s694_s2   ;;  %s1053_s1 = smov %s678_s22 }
  0x9a   : > { %p29_p6 = scmp.ge.s32.totalorder %s32_s2, 4   ;;  %s1054_s22 = smov %s682_s23 }
  0x9b   : > { %s1055_s23 = smov %s828_s9  ;;  %s1056_s24 = smov %s690_s25 }
  0x9c   : > { %s1057_s25 = smov %s1059_s28  ;;  %31 = sbr.rel (!%p29_p6) target bundleno = 34 (0x22), region = 86 }
  0xa3   :  { %328 = vsyncpa [#allocation7], 1 }
  0xa4   :  { %330 = vsyncpa [#allocation7 + $0x1], 1 }
  0xa5   :  { %331 = vsyncpa [#allocation10], 1 }
  0xa6   :  { %333 = vsyncpa [#allocation10 + $0x1], 1 }
  0xa7   :  { %334 = vsyncpa [#allocation8], 1 }
  0xa8   :  { %336 = vsyncpa [#allocation8 + $0x1], 1 }

</bundles_post_ra>
